<compile_context>
chip_gen: v7x
topology: tpu7x:2x2x1
jax: 0.10.0
libtpu: 0.0.40
codegen_flags: <defaults>
</compile_context>

<pallas_src>
import functools

import jax
import jax.numpy as jnp
from jax.experimental import pallas as pl
from jax.experimental.pallas import tpu as pltpu


def _round_up(x, m):
    return ((x + m - 1) // m) * m


def _linear_kernel(x_ref, w_ref, b_ref, o_ref, acc_ref):
    # x_ref: (tm, tk)   w_ref: (tk, tn)   b_ref: (1, tn)
    # o_ref: (tm, tn)   acc_ref: (tm, tn) f32 scratch, resident across the K axis
    k = pl.program_id(2)

    @pl.when(k == 0)
    def _init():
        acc_ref[...] = jnp.zeros_like(acc_ref)

    acc_ref[...] += jnp.dot(
        x_ref[...], w_ref[...], preferred_element_type=jnp.float32
    )

    @pl.when(k == pl.num_programs(2) - 1)
    def _store():
        o_ref[...] = (acc_ref[...] + b_ref[...].astype(jnp.float32)).astype(o_ref.dtype)


@functools.partial(jax.jit, static_argnames=("tm", "tn", "tk", "force_pallas"))
def target_fc(x, weight, bias, *, tm=512, tn=512, tk=512, force_pallas=False):
    """Pallas implementation of TargetFC.forward == F.linear(x, weight, bias)."""
    orig_shape = x.shape
    K = orig_shape[-1]
    N = weight.shape[0]
    assert weight.shape == (N, K)
    assert bias.shape == (N,)

    x2d = x.reshape(-1, K)
    M = x2d.shape[0]

    # Tiny problems: XLA's fused linear beats kernel-launch + pipeline overhead.
    if not force_pallas and (M * N * K) < (1 << 18):
        out2d = x2d @ weight.T + bias
        return out2d.reshape(*orig_shape[:-1], N)

    out_dtype = x.dtype

    # ---- lane-dense output: pad N (params only, one-time) up to a multiple of 128.
    Np = _round_up(N, 128)

    # ---- pre-transpose weight to (K, N): natural MXU orientation, N on the lane axis.
    w_t = weight.T  # (K, N)
    if Np != N:
        w_t = jnp.pad(w_t, ((0, 0), (0, Np - N)))
        bias = jnp.pad(bias, (0, Np - N))
    bias2d = bias.reshape(1, Np).astype(jnp.float32)

    # ---- K tiling: keep full K resident when it is small; otherwise pick a
    #      128-aligned tile that divides K (no padding of x); only pad K as a last resort.
    if K <= tk:
        tk_eff = K
    else:
        tk_eff = 0
        for cand in range(tk, 0, -128):
            if K % cand == 0:
                tk_eff = cand
                break
        if tk_eff == 0:
            tk_eff = tk
    Kp = _round_up(K, tk_eff)
    if Kp != K:
        # Rare path: zero-pad the reduction axis (zeros contribute nothing).
        x2d = jnp.pad(x2d, ((0, 0), (0, Kp - K)))
        w_t = jnp.pad(w_t, ((0, Kp - K), (0, 0)))

    # ---- M / N tiles (M is never padded; Pallas masks the partial last block).
    tm_eff = min(tm, _round_up(M, 8))     # multiple of 8 (sublane)
    tn_eff = min(tn, Np)                  # multiple of 128 (lane)

    grid = (pl.cdiv(M, tm_eff), pl.cdiv(Np, tn_eff), Kp // tk_eff)

    out = pl.pallas_call(
        _linear_kernel,
        out_shape=jax.ShapeDtypeStruct((M, Np), out_dtype),
        grid_spec=pltpu.PrefetchScalarGridSpec(
            num_scalar_prefetch=0,
            grid=grid,
            in_specs=[
                pl.BlockSpec((tm_eff, tk_eff), lambda i, j, k: (i, k)),   # x tile
                pl.BlockSpec((tk_eff, tn_eff), lambda i, j, k: (k, j)),   # W^T tile
                pl.BlockSpec((1, tn_eff), lambda i, j, k: (0, j)),        # bias row
            ],
            out_specs=pl.BlockSpec((tm_eff, tn_eff), lambda i, j, k: (i, j)),
            scratch_shapes=[pltpu.VMEM((tm_eff, tn_eff), jnp.float32)],
        ),
        compiler_params=pltpu.CompilerParams(
            # M/N shard across cores (v7x megacore); K (reduction) stays 'arbitrary'.
            dimension_semantics=("parallel", "parallel", "arbitrary"),
        ),
    )(x2d, w_t, bias2d)

    if Np != N:
        out = out[:, :N]
    return out.reshape(*orig_shape[:-1], N)


def _check(x, weight, bias, **kw):
    out = jax.block_until_ready(target_fc(x, weight, bias, **kw))
    ref = x @ weight.T + bias
    assert out.shape == ref.shape
    assert jnp.allclose(out, ref, atol=1e-4, rtol=1e-4)
    return out


if __name__ == "__main__":
    key = jax.random.PRNGKey(0)

    # 1) Small shapes consistent with the module: input (batch, seq, in_features).
    k_x, k_w, k_b = jax.random.split(key, 3)
    batch, seq, in_features, out_features = 2, 8, 32, 16
    x = jax.random.normal(k_x, (batch, seq, in_features), dtype=jnp.float32)
    weight = jax.random.normal(k_w, (out_features, in_features), dtype=jnp.float32) * 0.05
    bias = jax.random.normal(k_b, (out_features,), dtype=jnp.float32) * 0.05
    _check(x, weight, bias, force_pallas=True)   # exercise the Pallas path
    _check(x, weight, bias)                      # tiny-problem jnp dispatch path

    # 2) Non-divisible N / partial-M-tile path (lane padding of the output head).
    k_x2, k_w2, k_b2 = jax.random.split(jax.random.PRNGKey(1), 3)
    x2 = jax.random.normal(k_x2, (3, 100, 384), dtype=jnp.float32)
    w2 = jax.random.normal(k_w2, (272, 384), dtype=jnp.float32) * 0.02
    b2 = jax.random.normal(k_b2, (272,), dtype=jnp.float32) * 0.02
    _check(x2, w2, b2)

    # 3) K-tiled reduction path (K > tk -> f32 accumulator over the K grid axis).
    k_x3, k_w3, k_b3 = jax.random.split(jax.random.PRNGKey(2), 3)
    x3 = jax.random.normal(k_x3, (64, 1280), dtype=jnp.float32)
    w3 = jax.random.normal(k_w3, (256, 1280), dtype=jnp.float32) * 0.02
    b3 = jax.random.normal(k_b3, (256,), dtype=jnp.float32) * 0.02
    _check(x3, w3, b3)

    print("KERNEL_OK")
</pallas_src>

<mosaic_0001>
module attributes {stable_mosaic.version = 11 : i64} {
  func.func @_linear_kernel(%arg0: i32, %arg1: i32, %arg2: i32, %arg3: memref<16x32xf32, #tpu.memory_space<vmem>>, %arg4: memref<32x128xf32, #tpu.memory_space<vmem>>, %arg5: memref<1x128xf32, #tpu.memory_space<vmem>>, %arg6: memref<16x128xf32, #tpu.memory_space<vmem>>, %arg7: memref<16x128xf32, #tpu.memory_space<vmem>>) attributes {dimension_semantics = [#tpu.dimension_semantics<parallel>, #tpu.dimension_semantics<parallel>, #tpu.dimension_semantics<arbitrary>], iteration_bounds = array<i64: 1, 1, 1>, scalar_prefetch = 0 : i64, scratch_operands = 1 : i64, tpu.core_type = #tpu.core_type<tc>, window_params = [{transform_indices = @transform_0, window_bounds = array<i64: 16, 32>}, {transform_indices = @transform_1, window_bounds = array<i64: 32, 128>}, {transform_indices = @transform_2, window_bounds = array<i64: 1, 128>}, {transform_indices = @transform_3, window_bounds = array<i64: 16, 128>}]} {
    %c0_i32 = arith.constant 0 : i32
    %0 = arith.cmpi eq, %arg2, %c0_i32 : i32
    %1 = arith.extui %0 : i1 to i32
    %c0_i32_0 = arith.constant 0 : i32
    %2 = arith.cmpi ne, %1, %c0_i32_0 : i32
    scf.if %2 {
      %cst_10 = arith.constant 0.000000e+00 : f32
      %12 = vector.broadcast %cst_10 : f32 to vector<16x128xf32>
      %c0_11 = arith.constant 0 : index
      %c0_12 = arith.constant 0 : index
      %13 = vector.load %arg7[%c0_11, %c0_12] : memref<16x128xf32, #tpu.memory_space<vmem>>, vector<16x128xf32>
      tpu.vector_store %arg7[%c0_11, %c0_12], %12 {strides = array<i32>} : memref<16x128xf32, #tpu.memory_space<vmem>>, vector<16x128xf32>,
    } else {
    }
    %c0 = arith.constant 0 : index
    %c0_1 = arith.constant 0 : index
    %3 = vector.load %arg7[%c0, %c0_1] : memref<16x128xf32, #tpu.memory_space<vmem>>, vector<16x128xf32>
    %c0_2 = arith.constant 0 : index
    %c0_3 = arith.constant 0 : index
    %4 = vector.load %arg3[%c0_2, %c0_3] : memref<16x32xf32, #tpu.memory_space<vmem>>, vector<16x32xf32>
    %c0_4 = arith.constant 0 : index
    %c0_5 = arith.constant 0 : index
    %5 = vector.load %arg4[%c0_4, %c0_5] : memref<32x128xf32, #tpu.memory_space<vmem>>, vector<32x128xf32>
    %cst = arith.constant dense<0.000000e+00> : vector<16x128xf32>
    %6 = tpu.matmul %4, %5, %cst {dimension_numbers = #tpu.dot_dimension_numbers<[1], [0], [0], [1], [0, 0, 1, 1], [], []>} : vector<16x32xf32>, vector<32x128xf32>, vector<16x128xf32> -> vector<16x128xf32>
    %7 = arith.addf %3, %6 : vector<16x128xf32>
    %c0_6 = arith.constant 0 : index
    %c0_7 = arith.constant 0 : index
    %8 = vector.load %arg7[%c0_6, %c0_7] : memref<16x128xf32, #tpu.memory_space<vmem>>, vector<16x128xf32>
    tpu.vector_store %arg7[%c0_6, %c0_7], %7 {strides = array<i32>} : memref<16x128xf32, #tpu.memory_space<vmem>>, vector<16x128xf32>,
    %c0_i32_8 = arith.constant 0 : i32
    %9 = arith.cmpi eq, %arg2, %c0_i32_8 : i32
    %10 = arith.extui %9 : i1 to i32
    %c0_i32_9 = arith.constant 0 : i32
    %11 = arith.cmpi ne, %10, %c0_i32_9 : i32
    scf.if %11 {
      %c0_10 = arith.constant 0 : index
      %c0_11 = arith.constant 0 : index
      %12 = vector.load %arg7[%c0_10, %c0_11] : memref<16x128xf32, #tpu.memory_space<vmem>>, vector<16x128xf32>
      %c0_12 = arith.constant 0 : index
      %c0_13 = arith.constant 0 : index
      %13 = vector.load %arg5[%c0_12, %c0_13] : memref<1x128xf32, #tpu.memory_space<vmem>>, vector<1x128xf32>
      %14 = vector.broadcast %13 : vector<1x128xf32> to vector<16x128xf32>
      %15 = arith.addf %12, %14 : vector<16x128xf32>
      %c0_14 = arith.constant 0 : index
      %c0_15 = arith.constant 0 : index
      %16 = vector.load %arg6[%c0_14, %c0_15] : memref<16x128xf32, #tpu.memory_space<vmem>>, vector<16x128xf32>
      tpu.vector_store %arg6[%c0_14, %c0_15], %15 {strides = array<i32>} : memref<16x128xf32, #tpu.memory_space<vmem>>, vector<16x128xf32>,
    } else {
    }
    return
  }
  func.func @transform_0(%arg0: i32, %arg1: i32, %arg2: i32) -> (i32, i32) {
    %c0_i32 = arith.constant 0 : i32
    return %arg0, %arg2 : i32, i32
  }
  func.func @transform_1(%arg0: i32, %arg1: i32, %arg2: i32) -> (i32, i32) {
    %c0_i32 = arith.constant 0 : i32
    return %arg2, %arg1 : i32, i32
  }
  func.func @transform_2(%arg0: i32, %arg1: i32, %arg2: i32) -> (i32, i32) {
    %c0_i32 = arith.constant 0 : i32
    %c0_i32_0 = arith.constant 0 : i32
    return %c0_i32, %arg1 : i32, i32
  }
  func.func @transform_3(%arg0: i32, %arg1: i32, %arg2: i32) -> (i32, i32) {
    %c0_i32 = arith.constant 0 : i32
    return %arg0, %arg1 : i32, i32
  }
}

</mosaic_0001>

<bundles_post_ra>
// kernel: target_fc.1
= control target key start
LH: loop header
LB: loop body
LE: loop exit
PB: predicated region body
PF: predicated region fallthrough
CT: control target
= control target key end

     0   :  { %vm28_vm0 = vcmask 261120   ;;  %s209_s1 = inlined_call_operand.vmem [shape: f32[32,128], index: 1, kind: input, shape index: {}]   ;;  %s210_s0 = inlined_call_operand.vmem [shape: f32[16,32], index: 0, kind: input, shape index: {}]   ;;  %s211_s2 = inlined_call_operand.vmem [shape: f32[1,128], index: 2, kind: input, shape index: {}]   ;;  %s212_s3 = inlined_call_operand.vmem [shape: f32[16,128], index: 3, kind: output, shape index: {}]  }
   0x1   :  { %v24_v0 = vld [vmem:[%s209_s1] sm:$0xff]  ;;  %v25_v1 = vld [vmem:[%s209_s1 + $0x8] sm:$0xff]  ;;  %v26_v2 = vld [vmem:[%s209_s1 + $0x10] sm:$0xff] }
   0x2   :  { %v154_v3 = vpack.c.bf16 %v25_v1, %v24_v0  ;;  %v27_v4 = vld [vmem:[%s209_s1 + $0x18] sm:$0xff]  ;;  %v22_v5 = vld [vmem:[%s210_s0] sm:$0xff]  ;;  %v23_v7 = vld [vmem:[%s210_s0 + $0x8] sm:$0xff] }
   0x3   :  { %v158_v6 = vpack.c.bf16 %v27_v4, %v26_v2  ;;  %151 = vmatprep.mubr.msk.f32.mxu0 %vm28_vm0, %v22_v5  ;;  %v136_v8 = vld [vmem:[%s211_s2] ss:$0 sm:$0xff] }
   0x4   :  { %155 = vmatprep.subr.bf16.mxu0 %v154_v3 }
   0x5   :  { %157 = vmatpush3.bf16.msra.mxu0 %v154_v3 }
   0x6   :  { %159 = vmatprep.subr.bf16.mxu0 %v158_v6 }
   0x9   :  { %161 = vmatpush3.bf16.msra.mxu0 %v158_v6 }
   0xc   :  { %152 = vmatmul.mubr.msk.f32.vlgmr.msra.gmra.mrb[0].mxu0 %vm28_vm0, %v23_v7 }
  0xdf   :  { %v153_v9 = vpop.f32.mrb[0].mxu0 }
  0xe0   :  { %v127_v10 = vadd.f32 %v153_v9, %v136_v8  ;;  %v101_v11 = vpop.f32.mrb[1].mxu0 }
  0xe1   :  { %v126_v12 = vadd.f32 %v136_v8, %v101_v11 }
  0xe2   :  { %129 = vst [vmem:[%s212_s3 + $0x8] sm:$0xff] %v127_v10 }
  0xe3   :  { %128 = vst [vmem:[%s212_s3] sm:$0xff] %v126_v12 }

</bundles_post_ra>
